<compile_context>
chip_gen: v6e
topology: v6e:2x2x1
jax: 0.10.0
libtpu: 0.0.40
codegen_flags: <defaults>
</compile_context>

<pallas_src>
import functools

import jax
import jax.numpy as jnp
from jax.experimental import pallas as pl
from jax.experimental.pallas import tpu as pltpu

_MATMUL_DTYPE = jnp.bfloat16  # MXU input dtype; accumulation stays f32


def positional_encoding(positions, freqs):
    """Matches the PyTorch positional_encoding exactly (computed in f32)."""
    freq_bands = 2.0 ** jnp.arange(freqs, dtype=jnp.float32)           # (F,)
    pts = positions[..., None] * freq_bands                            # (..., 3, F)
    pts = pts.reshape(positions.shape[:-1] + (freqs * positions.shape[-1],))
    return jnp.concatenate([jnp.sin(pts), jnp.cos(pts)], axis=-1)      # (..., 2*F*3)


def _round_up(x, m):
    return (x + m - 1) // m * m


def _tensorcores_per_chip():
    """Best-effort detection of TensorCores per chip (v7x/v4/v5p = 2, else 1)."""
    try:
        kind = jax.devices()[0].device_kind.lower()
    except Exception:
        return 1
    return 2 if any(tag in kind for tag in ("7", "v4", "v5p")) else 1


def _choose_tile_n(n, *, max_tile=4096, align=128, num_cores=1):
    """Adaptive, generation-aware row tile.

    - Large tiles (up to 4096 rows) amortize the ~0.35 us per-grid-step
      pipeline overhead.
    - On single-TensorCore chips (v5e, v6e) a small batch is one program:
      splitting buys zero parallelism and adds a second pipeline step.
    - On 2-TensorCore chips (v7x megacore) aim for an even program count so
      both cores stay busy.
    """
    n_aligned = _round_up(max(n, 1), align)
    if num_cores <= 1:
        return min(max_tile, n_aligned)
    if n_aligned <= align:
        return align
    if n_aligned <= 2 * max_tile:
        # split once -> 2 programs
        return _round_up(pl.cdiv(n_aligned, 2), align)
    n_prog = pl.cdiv(n_aligned, max_tile)
    if n_prog % 2:
        n_prog += 1                                                    # even program count
    return min(max_tile, _round_up(pl.cdiv(n_aligned, n_prog), align))


def _mlp_render_kernel(x_ref, w1_ref, b12_ref, w2_ref, w3_ref, b3_ref, o_ref):
    # x_ref:  (TN, Cin) bf16    w1: (Cin, F) bf16   b12: (2, F) f32 (b1, b2)
    # w2: (F, F) bf16           w3: (F, 3)  bf16    b3: (1, 3) f32
    # o_ref: (TN, 3) f32
    x = x_ref[...]
    h1 = jnp.dot(x, w1_ref[...], preferred_element_type=jnp.float32)
    h1 = jnp.maximum(h1 + b12_ref[0:1, :], 0.0)                        # f32 elementwise
    h2 = jnp.dot(h1.astype(w2_ref.dtype), w2_ref[...],
                 preferred_element_type=jnp.float32)
    h2 = jnp.maximum(h2 + b12_ref[1:2, :], 0.0)
    y = jnp.dot(h2.astype(w3_ref.dtype), w3_ref[...],
                preferred_element_type=jnp.float32)
    o_ref[...] = jax.nn.sigmoid(y + b3_ref[...])                       # (TN, 3) store


@functools.partial(jax.jit, static_argnames=("viewpe", "pospe", "tile_n"))
def mlp_render_pe_forward(pts, viewdirs, features, params, *,
                          viewpe=6, pospe=6, tile_n=None):
    """Pallas implementation of MLPRender_PE.forward.

    pts:       (N, 3)
    viewdirs:  (N, 3)
    features:  (N, inChanel)
    params:    dict with w1,b1,w2,b2,w3,b3 (torch Linear weights stored (in, out)).

    Note: the PyTorch __init__ declares in_mlpC with an extra "+3" (raw pts)
    that the forward never concatenates; layer1 here is sized to the actual
    forward concat width so the forward-pass semantics are preserved and runnable.
    """
    # ---- glue: mlp_in = cat([features, viewdirs, PE(pts), PE(viewdirs)]) ----
    # Pieces are cast to bf16 *before* the concat so the PE (f32 sin/cos) +
    # cast + concat fuse into one XLA op; the only HBM materialization of the
    # MLP input is a single bf16 (N, Cin) array (no f32 intermediate).
    indata = [features.astype(_MATMUL_DTYPE), viewdirs.astype(_MATMUL_DTYPE)]
    if pospe > 0:
        indata.append(positional_encoding(pts, pospe).astype(_MATMUL_DTYPE))
    if viewpe > 0:
        indata.append(positional_encoding(viewdirs, viewpe).astype(_MATMUL_DTYPE))
    x = jnp.concatenate(indata, axis=-1)                               # (N, Cin) bf16, lane-tight

    n, in_mlpc = x.shape
    feat_c = params["w1"].shape[1]
    out_c = params["w3"].shape[1]                                      # = 3

    if tile_n is None:
        tile_n = _choose_tile_n(n, num_cores=_tensorcores_per_chip())
    n_pad = _round_up(n, tile_n)
    if n_pad != n:
        x = jnp.pad(x, ((0, n_pad - n), (0, 0)))                       # pad AFTER the bf16 cast

    # bf16 matmul operands (halves HBM reads, native MXU dtype); biases f32.
    w1 = params["w1"].astype(_MATMUL_DTYPE)
    w2 = params["w2"].astype(_MATMUL_DTYPE)
    w3 = params["w3"].astype(_MATMUL_DTYPE)
    b12 = jnp.stack([params["b1"], params["b2"]], axis=0).astype(jnp.float32)
    b3 = params["b3"].reshape(1, out_c).astype(jnp.float32)

    grid = (n_pad // tile_n,)
    out = pl.pallas_call(
        _mlp_render_kernel,
        out_shape=jax.ShapeDtypeStruct((n_pad, out_c), jnp.float32),
        grid_spec=pltpu.PrefetchScalarGridSpec(
            num_scalar_prefetch=0,
            grid=grid,
            in_specs=[
                pl.BlockSpec((tile_n, in_mlpc), lambda i: (i, 0)),     # x rows (true 102-lane width)
                pl.BlockSpec((in_mlpc, feat_c), lambda i: (0, 0)),     # w1 (resident)
                pl.BlockSpec((2, feat_c), lambda i: (0, 0)),           # b1, b2 packed
                pl.BlockSpec((feat_c, feat_c), lambda i: (0, 0)),      # w2
                pl.BlockSpec((feat_c, out_c), lambda i: (0, 0)),       # w3 (lane-tight)
                pl.BlockSpec((1, out_c), lambda i: (0, 0)),            # b3
            ],
            out_specs=pl.BlockSpec((tile_n, out_c), lambda i: (i, 0)),  # (TN, 3) output
        ),
        compiler_params=pltpu.CompilerParams(
            dimension_semantics=("parallel",),
            vmem_limit_bytes=48 * 1024 * 1024,                         # 4096-row tiles fit everywhere
        ),
    )(x, w1, b12, w2, w3, b3)

    return out[:n]                                                     # (N, 3)


def init_params(key, in_chanel, viewpe=6, pospe=6, feature_c=128):
    """Deterministic synthetic init matching torch Linear shapes (stored as (in, out))."""
    in_mlpc = in_chanel + 3 + 2 * pospe * 3 + 2 * viewpe * 3           # forward's actual width
    k1, k2, k3, k4, k5 = jax.random.split(key, 5)

    def unif(k, shape, fan_in):
        bound = 1.0 / jnp.sqrt(fan_in)
        return jax.random.uniform(k, shape, jnp.float32, -bound, bound)

    return {
        "w1": unif(k1, (in_mlpc, feature_c), in_mlpc),
        "b1": unif(k2, (feature_c,), in_mlpc),
        "w2": unif(k3, (feature_c, feature_c), feature_c),
        "b2": unif(k4, (feature_c,), feature_c),
        "w3": unif(k5, (feature_c, 3), feature_c),
        "b3": jnp.zeros((3,), jnp.float32),   # torch.nn.init.constant_(bias, 0)
    }


def _reference_forward(pts, viewdirs, features, params, viewpe=6, pospe=6):
    """Pure-JAX f32 reference for a correctness check."""
    indata = [features, viewdirs]
    if pospe > 0:
        indata.append(positional_encoding(pts, pospe))
    if viewpe > 0:
        indata.append(positional_encoding(viewdirs, viewpe))
    x = jnp.concatenate(indata, axis=-1)
    h = jnp.maximum(x @ params["w1"] + params["b1"], 0.0)
    h = jnp.maximum(h @ params["w2"] + params["b2"], 0.0)
    return jax.nn.sigmoid(h @ params["w3"] + params["b3"])


if __name__ == "__main__":
    key = jax.random.PRNGKey(0)
    in_chanel = 27     # typical TensoRF app-feature dim
    viewpe = 6
    pospe = 6
    feature_c = 128
    n = 256            # number of rays/samples (small demo)

    kp, ka, kv, kf = jax.random.split(key, 4)
    params = init_params(kp, in_chanel, viewpe=viewpe, pospe=pospe,
                         feature_c=feature_c)

    pts = jax.random.normal(ka, (n, 3), jnp.float32)
    viewdirs = jax.random.normal(kv, (n, 3), jnp.float32)
    viewdirs = viewdirs / jnp.linalg.norm(viewdirs, axis=-1, keepdims=True)
    features = jax.random.normal(kf, (n, in_chanel), jnp.float32)

    rgb = mlp_render_pe_forward(pts, viewdirs, features, params,
                                viewpe=viewpe, pospe=pospe)
    rgb = jax.block_until_ready(rgb)

    ref = _reference_forward(pts, viewdirs, features, params,
                             viewpe=viewpe, pospe=pospe)
    assert rgb.shape == (n, 3), rgb.shape
    max_err = float(jnp.max(jnp.abs(rgb - ref)))
    # bf16 matmul inputs (f32 accumulation) -> looser tolerance than pure-f32.
    assert max_err < 2e-2, max_err

    print("KERNEL_OK")
</pallas_src>

<mosaic_0001>
module attributes {stable_mosaic.version = 11 : i64} {
  func.func @_mlp_render_kernel(%arg0: i32, %arg1: memref<256x102xbf16, #tpu.memory_space<vmem>>, %arg2: memref<102x128xbf16, #tpu.memory_space<vmem>>, %arg3: memref<2x128xf32, #tpu.memory_space<vmem>>, %arg4: memref<128x128xbf16, #tpu.memory_space<vmem>>, %arg5: memref<128x3xbf16, #tpu.memory_space<vmem>>, %arg6: memref<1x3xf32, #tpu.memory_space<vmem>>, %arg7: memref<256x3xf32, #tpu.memory_space<vmem>>) attributes {dimension_semantics = [#tpu.dimension_semantics<parallel>], iteration_bounds = array<i64: 1>, scalar_prefetch = 0 : i64, scratch_operands = 0 : i64, tpu.core_type = #tpu.core_type<tc>, window_params = [{transform_indices = @transform_0, window_bounds = array<i64: 256, 102>}, {pipeline_mode = #tpu.pipeline_mode<synchronous>, transform_indices = @transform_1, window_bounds = array<i64: 102, 128>}, {pipeline_mode = #tpu.pipeline_mode<synchronous>, transform_indices = @transform_2, window_bounds = array<i64: 2, 128>}, {pipeline_mode = #tpu.pipeline_mode<synchronous>, transform_indices = @transform_3, window_bounds = array<i64: 128, 128>}, {pipeline_mode = #tpu.pipeline_mode<synchronous>, transform_indices = @transform_4, window_bounds = array<i64: 128, 3>}, {pipeline_mode = #tpu.pipeline_mode<synchronous>, transform_indices = @transform_5, window_bounds = array<i64: 1, 3>}, {transform_indices = @transform_6, window_bounds = array<i64: 256, 3>}]} {
    %c0 = arith.constant 0 : index
    %c0_0 = arith.constant 0 : index
    %0 = vector.load %arg1[%c0, %c0_0] : memref<256x102xbf16, #tpu.memory_space<vmem>>, vector<256x102xbf16>
    %c0_1 = arith.constant 0 : index
    %c0_2 = arith.constant 0 : index
    %1 = vector.load %arg2[%c0_1, %c0_2] : memref<102x128xbf16, #tpu.memory_space<vmem>>, vector<102x128xbf16>
    %cst = arith.constant dense<0.000000e+00> : vector<256x128xf32>
    %2 = tpu.matmul %0, %1, %cst {dimension_numbers = #tpu.dot_dimension_numbers<[1], [0], [0], [1], [0, 0, 1, 1], [], []>} : vector<256x102xbf16>, vector<102x128xbf16>, vector<256x128xf32> -> vector<256x128xf32>
    %c0_3 = arith.constant 0 : index
    %c0_4 = arith.constant 0 : index
    %3 = vector.load %arg3[%c0_3, %c0_4] : memref<2x128xf32, #tpu.memory_space<vmem>>, vector<1x128xf32>
    %4 = vector.broadcast %3 : vector<1x128xf32> to vector<256x128xf32>
    %5 = arith.addf %2, %4 : vector<256x128xf32>
    %cst_5 = arith.constant 0.000000e+00 : f32
    %6 = vector.broadcast %cst_5 : f32 to vector<256x128xf32>
    %7 = arith.maximumf %5, %6 : vector<256x128xf32>
    %8 = arith.truncf %7 : vector<256x128xf32> to vector<256x128xbf16>
    %c0_6 = arith.constant 0 : index
    %c0_7 = arith.constant 0 : index
    %9 = vector.load %arg4[%c0_6, %c0_7] : memref<128x128xbf16, #tpu.memory_space<vmem>>, vector<128x128xbf16>
    %cst_8 = arith.constant dense<0.000000e+00> : vector<256x128xf32>
    %10 = tpu.matmul %8, %9, %cst_8 {dimension_numbers = #tpu.dot_dimension_numbers<[1], [0], [0], [1], [0, 0, 1, 1], [], []>} : vector<256x128xbf16>, vector<128x128xbf16>, vector<256x128xf32> -> vector<256x128xf32>
    %c1 = arith.constant 1 : index
    %c0_9 = arith.constant 0 : index
    %11 = vector.load %arg3[%c1, %c0_9] : memref<2x128xf32, #tpu.memory_space<vmem>>, vector<1x128xf32>
    %12 = vector.broadcast %11 : vector<1x128xf32> to vector<256x128xf32>
    %13 = arith.addf %10, %12 : vector<256x128xf32>
    %cst_10 = arith.constant 0.000000e+00 : f32
    %14 = vector.broadcast %cst_10 : f32 to vector<256x128xf32>
    %15 = arith.maximumf %13, %14 : vector<256x128xf32>
    %16 = arith.truncf %15 : vector<256x128xf32> to vector<256x128xbf16>
    %c0_11 = arith.constant 0 : index
    %c0_12 = arith.constant 0 : index
    %17 = vector.load %arg5[%c0_11, %c0_12] : memref<128x3xbf16, #tpu.memory_space<vmem>>, vector<128x3xbf16>
    %cst_13 = arith.constant dense<0.000000e+00> : vector<256x3xf32>
    %18 = tpu.matmul %16, %17, %cst_13 {dimension_numbers = #tpu.dot_dimension_numbers<[1], [0], [0], [1], [0, 0, 1, 1], [], []>} : vector<256x128xbf16>, vector<128x3xbf16>, vector<256x3xf32> -> vector<256x3xf32>
    %c0_14 = arith.constant 0 : index
    %c0_15 = arith.constant 0 : index
    %19 = vector.load %arg6[%c0_14, %c0_15] : memref<1x3xf32, #tpu.memory_space<vmem>>, vector<1x3xf32>
    %20 = vector.broadcast %19 : vector<1x3xf32> to vector<256x3xf32>
    %21 = arith.addf %18, %20 : vector<256x3xf32>
    %22 = arith.negf %21 : vector<256x3xf32>
    %23 = math.exp %22 : vector<256x3xf32>
    %cst_16 = arith.constant 1.000000e+00 : f32
    %24 = vector.broadcast %cst_16 : f32 to vector<256x3xf32>
    %25 = arith.addf %24, %23 : vector<256x3xf32>
    %26 = arith.divf %24, %25 : vector<256x3xf32>
    %c0_17 = arith.constant 0 : index
    %c0_18 = arith.constant 0 : index
    %27 = vector.load %arg7[%c0_17, %c0_18] : memref<256x3xf32, #tpu.memory_space<vmem>>, vector<256x3xf32>
    tpu.vector_store %arg7[%c0_17, %c0_18], %26 {strides = array<i32>} : memref<256x3xf32, #tpu.memory_space<vmem>>, vector<256x3xf32>,
    return
  }
  func.func @transform_0(%arg0: i32) -> (i32, i32) {
    %c0_i32 = arith.constant 0 : i32
    %c0_i32_0 = arith.constant 0 : i32
    return %arg0, %c0_i32 : i32, i32
  }
  func.func @transform_1(%arg0: i32) -> (i32, i32) {
    %c0_i32 = arith.constant 0 : i32
    %c0_i32_0 = arith.constant 0 : i32
    %c0_i32_1 = arith.constant 0 : i32
    return %c0_i32, %c0_i32_0 : i32, i32
  }
  func.func @transform_2(%arg0: i32) -> (i32, i32) {
    %c0_i32 = arith.constant 0 : i32
    %c0_i32_0 = arith.constant 0 : i32
    %c0_i32_1 = arith.constant 0 : i32
    return %c0_i32, %c0_i32_0 : i32, i32
  }
  func.func @transform_3(%arg0: i32) -> (i32, i32) {
    %c0_i32 = arith.constant 0 : i32
    %c0_i32_0 = arith.constant 0 : i32
    %c0_i32_1 = arith.constant 0 : i32
    return %c0_i32, %c0_i32_0 : i32, i32
  }
  func.func @transform_4(%arg0: i32) -> (i32, i32) {
    %c0_i32 = arith.constant 0 : i32
    %c0_i32_0 = arith.constant 0 : i32
    %c0_i32_1 = arith.constant 0 : i32
    return %c0_i32, %c0_i32_0 : i32, i32
  }
  func.func @transform_5(%arg0: i32) -> (i32, i32) {
    %c0_i32 = arith.constant 0 : i32
    %c0_i32_0 = arith.constant 0 : i32
    %c0_i32_1 = arith.constant 0 : i32
    return %c0_i32, %c0_i32_0 : i32, i32
  }
  func.func @transform_6(%arg0: i32) -> (i32, i32) {
    %c0_i32 = arith.constant 0 : i32
    %c0_i32_0 = arith.constant 0 : i32
    return %arg0, %c0_i32 : i32, i32
  }
}

</mosaic_0001>

<bundles_post_ra>
// kernel: mlp_render_pe_forward.1
= control target key start
LH: loop header
LB: loop body
LE: loop exit
PB: predicated region body
PF: predicated region fallthrough
CT: control target
= control target key end

     0   :  { %vm242_vm0 = vcmask 1042432   ;;  %vm193_vm1 = vcmask 834560   ;;  %vm1157_vm2 = vcmask 23552   ;;  %s2102_s1 = inlined_call_operand.vmem [shape: bf16[102,128], index: 1, kind: input, shape index: {}]   ;;  %s2103_s0 = inlined_call_operand.vmem [shape: bf16[256,102], index: 0, kind: input, shape index: {}]   ;;  %s2104_s3 = inlined_call_operand.vmem [shape: bf16[128,128], index: 3, kind: input, shape index: {}]   ;;  %s2105_s4 = inlined_call_operand.vmem [shape: bf16[128,3], index: 4, kind: input, shape index: {}]   ;;  %s2106_s2 = inlined_call_operand.vmem [shape: f32[2,128], index: 2, kind: input, shape index: {}]   ;;  %s2107_s5 = inlined_call_operand.vmem [shape: f32[1,3], index: 5, kind: input, shape index: {}]   ;;  %s2108_s6 = inlined_call_operand.vmem [shape: f32[256,3], index: 6, kind: output, shape index: {}]  }
   0x1   :  { %v1513_v0 = vld [vmem:[%s2102_s1 + $0x30] ss:$0 sps:$4 sm:$0x77]   ;;  %v1514_v1 = vld [vmem:[%s2102_s1 + $0x28] sm:$0xff]   ;;  %v1515_v3 = vld [vmem:[%s2102_s1 + $0x20] sm:$0xff]  }
   0x2   :  { %1511 = vmatprep.subr.msk.bf16.mxu0 %vm242_vm0, %v1513_v0  ;;  %v244_v2 = vsel %vm242_vm0, %v1513_v0, 0  ;;  %1512 = vmatprep.subr.msk.bf16.mxu1 %vm242_vm0, %v1513_v0  ;;  %v1520_v4 = vld [vmem:[%s2103_s0] sm:$0xff]   ;;  %v1516_v5 = vld [vmem:[%s2102_s1 + $0x18] sm:$0xff]   ;;  %v1517_v6 = vld [vmem:[%s2102_s1 + $0x10] sm:$0xff]  }
   0x3   :  { %1356 = vmatpush3.bf16.msra.mxu0 %v244_v2  ;;  %1504 = vmatpush3.bf16.msra.mxu1 %v244_v2  ;;  %v1528_v7 = vld [vmem:[%s2103_s0 + $0x40] sm:$0xff]   ;;  %v1518_v8 = vld [vmem:[%s2102_s1 + $0x8] sm:$0xff]   ;;  %v1536_v11 = vld [vmem:[%s2104_s3 + $0x38] sm:$0xff]  }
   0x4   :  { %1357 = vmatprep.subr.bf16.mxu0 %v1514_v1  ;;  %1498 = vmatprep.subr.bf16.mxu1 %v1514_v1  ;;  %v1519_v9 = vld [vmem:[%s2102_s1] sm:$0xff]   ;;  %v1521_v10 = vld [vmem:[%s2103_s0 + $0x8] sm:$0xff]   ;;  %v1522_v12 = vld [vmem:[%s2103_s0 + $0x10] sm:$0xff]  }
   0x5   :  { %1369 = vmatprep.mubr.msk.bf16.mxu0 %vm193_vm1, %v1520_v4  ;;  %1385 = vmatprep.mubr.msk.bf16.mxu1 %vm193_vm1, %v1528_v7  ;;  %v1529_v13 = vld [vmem:[%s2103_s0 + $0x48] sm:$0xff]   ;;  %v1530_v14 = vld [vmem:[%s2103_s0 + $0x50] sm:$0xff]   ;;  %v1523_v17 = vld [vmem:[%s2103_s0 + $0x18] sm:$0xff]  }
   0x6   :  { %v1537_v15 = vld [vmem:[%s2104_s3 + $0x30] sm:$0xff]   ;;  %v1538_v16 = vld [vmem:[%s2104_s3 + $0x28] sm:$0xff]   ;;  %v1531_v18 = vld [vmem:[%s2103_s0 + $0x58] sm:$0xff]  }
   0x7   :  { %1358 = vmatpush3.bf16.msra.mxu0 %v1514_v1  ;;  %1505 = vmatpush3.bf16.msra.mxu1 %v1514_v1  ;;  %v1524_v19 = vld [vmem:[%s2103_s0 + $0x20] sm:$0xff]   ;;  %v1540_v22 = vld [vmem:[%s2104_s3 + $0x18] sm:$0xff]   ;;  %v1525_v23 = vld [vmem:[%s2103_s0 + $0x28] sm:$0xff]  }
   0x8   :  { %1359 = vmatprep.subr.bf16.mxu0 %v1515_v3  ;;  %1499 = vmatprep.subr.bf16.mxu1 %v1515_v3  ;;  %v1532_v20 = vld [vmem:[%s2103_s0 + $0x60] sm:$0xff]   ;;  %v1533_v24 = vld [vmem:[%s2103_s0 + $0x68] sm:$0xff]   ;;  %v1526_v25 = vld [vmem:[%s2103_s0 + $0x30] sm:$0xff]  }
   0x9   :  { %v1539_v21 = vld [vmem:[%s2104_s3 + $0x20] sm:$0xff]   ;;  %v1534_v26 = vld [vmem:[%s2103_s0 + $0x70] sm:$0xff]   ;;  %v1527_v27 = vld [vmem:[%s2103_s0 + $0x38] sm:$0xff]  }
   0xa   :  { %v1535_v28 = vld [vmem:[%s2103_s0 + $0x78] sm:$0xff]   ;;  %v1541_v29 = vld [vmem:[%s2104_s3 + $0x10] sm:$0xff]   ;;  %v1542_v30 = vld [vmem:[%s2104_s3 + $0x8] sm:$0xff]  }
   0xb   :  { %1360 = vmatpush3.bf16.msra.mxu0 %v1515_v3  ;;  %1506 = vmatpush3.bf16.msra.mxu1 %v1515_v3  ;;  %v1543_v31 = vld [vmem:[%s2104_s3] sm:$0xff]   ;;  %v1544_v32 = vld [vmem:[%s2105_s4 + $0x38] sm:$0xff]   ;;  %v1545_v33 = vld [vmem:[%s2105_s4 + $0x30] sm:$0xff]  }
   0xc   :  { %1361 = vmatprep.subr.bf16.mxu0 %v1516_v5  ;;  %1500 = vmatprep.subr.bf16.mxu1 %v1516_v5  ;;  %v1546_v34 = vld [vmem:[%s2105_s4 + $0x28] sm:$0xff]   ;;  %v1547_v35 = vld [vmem:[%s2105_s4 + $0x20] sm:$0xff]   ;;  %v1548_v36 = vld [vmem:[%s2105_s4 + $0x18] sm:$0xff]  }
   0xd   :  { %v1844_v41 = vld [vmem:[%s2106_s2] ss:$0 sm:$0xff] }
   0xf   :  { %1362 = vmatpush3.bf16.msra.mxu0 %v1516_v5  ;;  %1507 = vmatpush3.bf16.msra.mxu1 %v1516_v5 }
  0x10   :  { %1363 = vmatprep.subr.bf16.mxu0 %v1517_v6  ;;  %1501 = vmatprep.subr.bf16.mxu1 %v1517_v6 }
  0x13   :  { %1364 = vmatpush3.bf16.msra.mxu0 %v1517_v6  ;;  %1508 = vmatpush3.bf16.msra.mxu1 %v1517_v6 }
  0x14   :  { %1365 = vmatprep.subr.bf16.mxu0 %v1518_v8  ;;  %1502 = vmatprep.subr.bf16.mxu1 %v1518_v8 }
  0x17   :  { %1366 = vmatpush3.bf16.msra.mxu0 %v1518_v8  ;;  %1509 = vmatpush3.bf16.msra.mxu1 %v1518_v8 }
  0x18   :  { %1367 = vmatprep.subr.bf16.mxu0 %v1519_v9  ;;  %1503 = vmatprep.subr.bf16.mxu1 %v1519_v9 }
  0x1b   :  { %1368 = vmatpush3.bf16.msra.mxu0 %v1519_v9  ;;  %1510 = vmatpush3.bf16.msra.mxu1 %v1519_v9 }
  0x1c   :  { %1401 = vmatprep.subr.bf16.mxu1 %v1536_v11  ;;  %1449 = vmatprep.subr.bf16.mxu0 %v1544_v32 }
  0x1e   :  { %1370 = vmatmul.mubr.msk.bf16.vlgmr.msra.gmra.mxu0 %vm193_vm1, %v1521_v10  ;;  %1386 = vmatmul.mubr.msk.bf16.vlgmr.msra.gmra.mxu1 %vm193_vm1, %v1529_v13 }
  0x1f   :  { %1373 = vmatprep.mubr.msk.bf16.mxu0 %vm193_vm1, %v1522_v12  ;;  %1389 = vmatprep.mubr.msk.bf16.mxu1 %vm193_vm1, %v1530_v14 }
  0x20   :  { %1402 = vmatpush3.bf16.msra.mxu1 %v1536_v11  ;;  %1450 = vmatpush3.bf16.msra.mxu0 %v1544_v32 }
  0x21   :  { %1403 = vmatprep.subr.bf16.mxu1 %v1537_v15  ;;  %1451 = vmatprep.subr.bf16.mxu0 %v1545_v33 }
  0x24   :  { %1404 = vmatpush3.bf16.msra.mxu1 %v1537_v15  ;;  %1452 = vmatpush3.bf16.msra.mxu0 %v1545_v33 }
  0x25   :  { %1405 = vmatprep.subr.bf16.mxu1 %v1538_v16  ;;  %1453 = vmatprep.subr.bf16.mxu0 %v1546_v34 }
  0x26   :  { %1374 = vmatmul.mubr.msk.bf16.gmra.mxu0 %vm193_vm1, %v1523_v17  ;;  %1390 = vmatmul.mubr.msk.bf16.gmra.mxu1 %vm193_vm1, %v1531_v18 }
  0x27   :  { %1377 = vmatprep.mubr.msk.bf16.mxu0 %vm193_vm1, %v1524_v19  ;;  %1393 = vmatprep.mubr.msk.bf16.mxu1 %vm193_vm1, %v1532_v20 }
  0x28   :  { %1406 = vmatpush3.bf16.msra.mxu1 %v1538_v16  ;;  %1454 = vmatpush3.bf16.msra.mxu0 %v1546_v34 }
  0x29   :  { %1407 = vmatprep.subr.bf16.mxu1 %v1539_v21  ;;  %1455 = vmatprep.subr.bf16.mxu0 %v1547_v35 }
  0x2c   :  { %1408 = vmatpush3.bf16.msra.mxu1 %v1539_v21  ;;  %1456 = vmatpush3.bf16.msra.mxu0 %v1547_v35 }
  0x2d   :  { %1409 = vmatprep.subr.bf16.mxu1 %v1540_v22  ;;  %1457 = vmatprep.subr.bf16.mxu0 %v1548_v36 }
  0x2e   :  { %1378 = vmatmul.mubr.msk.bf16.gmra.mxu0 %vm193_vm1, %v1525_v23  ;;  %1394 = vmatmul.mubr.msk.bf16.gmra.mxu1 %vm193_vm1, %v1533_v24 }
  0x2f   :  { %1381 = vmatprep.mubr.msk.bf16.mxu0 %vm193_vm1, %v1526_v25  ;;  %1397 = vmatprep.mubr.msk.bf16.mxu1 %vm193_vm1, %v1534_v26 }
  0x30   :  { %1410 = vmatpush3.bf16.msra.mxu1 %v1540_v22  ;;  %1458 = vmatpush3.bf16.msra.mxu0 %v1548_v36 }
  0x31   :  { %1411 = vmatprep.subr.bf16.mxu1 %v1541_v29 }
  0x34   :  { %1412 = vmatpush3.bf16.msra.mxu1 %v1541_v29 }
  0x35   :  { %1413 = vmatprep.subr.bf16.mxu1 %v1542_v30 }
  0x36   :  { %1382 = vmatmul.mubr.msk.bf16.gmra.mxu0 %vm193_vm1, %v1527_v27  ;;  %1398 = vmatmul.mubr.msk.bf16.gmra.mxu1 %vm193_vm1, %v1535_v28 }
  0x38   :  { %1414 = vmatpush3.bf16.msra.mxu1 %v1542_v30 }
  0x39   :  { %1415 = vmatprep.subr.bf16.mxu1 %v1543_v31 }
  0x3c   :  { %1416 = vmatpush3.bf16.msra.mxu1 %v1543_v31 }
  0xde   :  { %v1371_v37 = vpop.f32.mrf.mxu0  ;;  %v1839_v38 = vpop.f32.mrf.mxu1 }
  0xdf   :  { %v289_v46 = vadd.f32 %v1371_v37, %v1844_v41 }
  0xe0   :  { %v280_v39 = vpop.f32.mrf.mxu0  ;;  %v344_v40 = vpop.f32.mrf.mxu1 }
  0xe1   :  { %v281_v44 = vadd.f32 %v1844_v41, %v280_v39  ;;  %v409_v55 = vmax.f32 %v289_v46, 0.0  ;;  %v345_v27 = vadd.f32 %v1844_v41, %v344_v40 }
  0xe2   :  { %v1372_v42 = vpop.f32.mrf.mxu0  ;;  %v1846_v43 = vpop.f32.mrf.mxu1 }
  0xe3   :  { %v292_v45 = vadd.f32 %v1372_v42, %v1844_v41  ;;  %v407_v53 = vmax.f32 %v281_v44, 0.0  ;;  %v423_v36 = vmax.f32 %v345_v27, 0.0  ;;  %v1903_v27 = vld [vmem:[%s2106_s2 + $0x1] ss:$0 sm:$0xff] }
  0xe4   :  { %v283_v47 = vpop.f32.mrf.mxu0  ;;  %v347_v48 = vpop.f32.mrf.mxu1 }
  0xe5   :  { %v284_v49 = vadd.f32 %v1844_v41, %v283_v47  ;;  %v410_v50 = vmax.f32 %v292_v45, 0.0  ;;  %v348_v28 = vadd.f32 %v1844_v41, %v347_v48 }
  0xe6   :  { %v1375_v51 = vpop.f32.mrf.mxu0  ;;  %v1852_v52 = vpop.f32.mrf.mxu1 }
  0xe7   :  { %v408_v54 = vmax.f32 %v284_v49, 0.0  ;;  %v440_v59 = vpack.c.bf16 %v410_v50, %v409_v55  ;;  %v305_v0 = vadd.f32 %v1375_v51, %v1844_v41  ;;  %v424_v39 = vmax.f32 %v348_v28, 0.0 }
  0xe8   :  { %v296_v56 = vpop.f32.mrf.mxu0  ;;  %v360_v57 = vpop.f32.mrf.mxu1  ;;  %v353_v51 = vadd.f32 %v1839_v38, %v1844_v41  ;;  %v369_v38 = vadd.f32 %v1852_v52, %v1844_v41 }
  0xe9   :  { %v439_v58 = vpack.c.bf16 %v408_v54, %v407_v53  ;;  %v297_v62 = vadd.f32 %v1844_v41, %v296_v56  ;;  %v413_v8 = vmax.f32 %v305_v0, 0.0  ;;  %v447_v48 = vpack.c.bf16 %v424_v39, %v423_v36 }
  0xea   :  { %v1376_v60 = vpop.f32.mrf.mxu0  ;;  %v1854_v61 = vpop.f32.mrf.mxu1  ;;  %v361_v49 = vadd.f32 %v1844_v41, %v360_v57  ;;  %v356_v54 = vadd.f32 %v1846_v43, %v1844_v41 }
  0xeb   :  { %v308_v63 = vadd.f32 %v1376_v60, %v1844_v41  ;;  %1417 = vmatprep.mubr.bf16.mxu1 %v439_v58  ;;  %v411_v6 = vmax.f32 %v297_v62, 0.0  ;;  %v372_v43 = vadd.f32 %v1854_v61, %v1844_v41 }
  0xec   :  { %v299_v1 = vpop.f32.mrf.mxu0  ;;  %1418 = vmatmul.mubr.bf16.vlgmr.msra.gmra.mxu1 %v440_v59  ;;  %v363_v5 = vpop.f32.mrf.mxu1  ;;  %v427_v56 = vmax.f32 %v361_v49, 0.0  ;;  %v425_v59 = vmax.f32 %v353_v51, 0.0  ;;  %v426_v60 = vmax.f32 %v356_v54, 0.0 }
  0xed   :  { %v300_v2 = vadd.f32 %v1844_v41, %v299_v1  ;;  %v414_v3 = vmax.f32 %v308_v63, 0.0  ;;  %v364_v50 = vadd.f32 %v1844_v41, %v363_v5  ;;  %v429_v5 = vmax.f32 %v369_v38, 0.0 }
  0xee   :  { %v1379_v4 = vpop.f32.mrf.mxu0  ;;  %v1860_v13 = vpop.f32.mrf.mxu1  ;;  %v448_v1 = vpack.c.bf16 %v426_v60, %v425_v59 }
  0xef   :  { %v412_v7 = vmax.f32 %v300_v2, 0.0  ;;  %v442_v11 = vpack.c.bf16 %v414_v3, %v413_v8  ;;  %v321_v16 = vadd.f32 %v1379_v4, %v1844_v41  ;;  %v428_v58 = vmax.f32 %v364_v50, 0.0 }
  0xf0   :  { %v312_v9 = vpop.f32.mrf.mxu0  ;;  %v376_v21 = vpop.f32.mrf.mxu1  ;;  %v385_v52 = vadd.f32 %v1860_v13, %v1844_v41  ;;  %v1549_v13 = vld [vmem:[%s2105_s4 + $0x10] sm:$0xff]  }
  0xf1   :  { %v441_v10 = vpack.c.bf16 %v412_v7, %v411_v6  ;;  %v313_v14 = vadd.f32 %v1844_v41, %v312_v9  ;;  %v417_v24 = vmax.f32 %v321_v16, 0.0  ;;  %v449_v63 = vpack.c.bf16 %v428_v58, %v427_v56  ;;  %1459 = vmatprep.subr.bf16.mxu0 %v1549_v13 }
  0xf2   :  { %v1380_v12 = vpop.f32.mrf.mxu0  ;;  %v1396_v31 = vpop.f32.mrf.mxu1  ;;  %v377_v57 = vadd.f32 %v1844_v41, %v376_v21  ;;  %v430_v6 = vmax.f32 %v372_v43, 0.0  ;;  %1460 = vmatpush3.bf16.msra.mxu0 %v1549_v13 }
  0xf3   :  { %v324_v15 = vadd.f32 %v1380_v12, %v1844_v41  ;;  %1421 = vmatprep.mubr.bf16.mxu1 %v441_v10  ;;  %v415_v22 = vmax.f32 %v313_v14, 0.0  ;;  %v388_v12 = vadd.f32 %v1396_v31, %v1844_v41 }
  0xf4   :  { %v315_v17 = vpop.f32.mrf.mxu0  ;;  %1422 = vmatmul.mubr.bf16.gmra.mxu1 %v442_v11  ;;  %v379_v40 = vpop.f32.mrf.mxu1  ;;  %v431_v3 = vmax.f32 %v377_v57, 0.0  ;;  %v450_v11 = vpack.c.bf16 %v430_v6, %v429_v5 }
  0xf5   :  { %v316_v18 = vadd.f32 %v1844_v41, %v315_v17  ;;  %v418_v19 = vmax.f32 %v324_v15, 0.0  ;;  %v380_v0 = vadd.f32 %v1844_v41, %v379_v40  ;;  %v433_v15 = vmax.f32 %v385_v52, 0.0 }
  0xf6   :  { %v1383_v20 = vpop.f32.mrf.mxu0  ;;  %v1399_v55 = vpop.f32.mrf.mxu1  ;;  %v434_v16 = vmax.f32 %v388_v12, 0.0 }
  0xf7   :  { %v416_v23 = vmax.f32 %v316_v18, 0.0  ;;  %v444_v29 = vpack.c.bf16 %v418_v19, %v417_v24  ;;  %v337_v34 = vadd.f32 %v1383_v20, %v1844_v41  ;;  %v432_v4 = vmax.f32 %v380_v0, 0.0  ;;  %v1550_v24 = vld [vmem:[%s2105_s4 + $0x8] sm:$0xff]  }
  0xf8   :  { %v328_v25 = vpop.f32.mrf.mxu0  ;;  %v392_v62 = vpop.f32.mrf.mxu1  ;;  %v452_v18 = vpack.c.bf16 %v434_v16, %v433_v15  ;;  %v401_v19 = vadd.f32 %v1399_v55, %v1844_v41  ;;  %1461 = vmatprep.subr.bf16.mxu0 %v1550_v24 }
  0xf9   :  { %v443_v26 = vpack.c.bf16 %v416_v23, %v415_v22  ;;  %v329_v32 = vadd.f32 %v1844_v41, %v328_v25  ;;  %v421_v46 = vmax.f32 %v337_v34, 0.0  ;;  %v451_v8 = vpack.c.bf16 %v432_v4, %v431_v3  ;;  %1462 = vmatpush3.bf16.msra.mxu0 %v1550_v24 }
  0xfa   :  { %v1384_v30 = vpop.f32.mrf.mxu0  ;;  %v1400_v2 = vpop.f32.mrf.mxu1  ;;  %v393_v9 = vadd.f32 %v1844_v41, %v392_v62  ;;  %v437_v21 = vmax.f32 %v401_v19, 0.0 }
  0xfb   :  { %v340_v33 = vadd.f32 %v1384_v30, %v1844_v41  ;;  %1425 = vmatprep.mubr.bf16.mxu1 %v443_v26  ;;  %v419_v44 = vmax.f32 %v329_v32, 0.0  ;;  %v404_v20 = vadd.f32 %v1400_v2, %v1844_v41 }
  0xfc   :  { %v331_v35 = vpop.f32.mrf.mxu0  ;;  %1426 = vmatmul.mubr.bf16.gmra.mxu1 %v444_v29  ;;  %v395_v7 = vpop.f32.mrf.mxu1  ;;  %v435_v61 = vmax.f32 %v393_v9, 0.0 }
  0xfd   :  { %v332_v37 = vadd.f32 %v1844_v41, %v331_v35  ;;  %v422_v42 = vmax.f32 %v340_v33, 0.0  ;;  %v396_v10 = vadd.f32 %v1844_v41, %v395_v7  ;;  %v438_v22 = vmax.f32 %v404_v20, 0.0  ;;  %v1551_v41 = vld [vmem:[%s2105_s4] sm:$0xff]  }
  0xfe   :  { %1463 = vmatprep.subr.bf16.mxu0 %v1551_v41 }
  0xff   :  { %v420_v45 = vmax.f32 %v332_v37, 0.0  ;;  %v446_v53 = vpack.c.bf16 %v422_v42, %v421_v46  ;;  %v436_v14 = vmax.f32 %v396_v10, 0.0  ;;  %v454_v23 = vpack.c.bf16 %v438_v22, %v437_v21  ;;  %1464 = vmatpush3.bf16.msra.mxu0 %v1551_v41 }
 0x101   :  { %v445_v47 = vpack.c.bf16 %v420_v45, %v419_v44  ;;  %v453_v17 = vpack.c.bf16 %v436_v14, %v435_v61 }
 0x103   :  { %1429 = vmatprep.mubr.bf16.mxu1 %v445_v47 }
 0x104   :  { %1430 = vmatmul.mubr.bf16.gmra.mxu1 %v446_v53 }
 0x105   :  { %1433 = vmatprep.mubr.bf16.mxu1 %v447_v48 }
 0x10c   :  { %1434 = vmatmul.mubr.bf16.gmra.mxu1 %v448_v1 }
 0x10d   :  { %1437 = vmatprep.mubr.bf16.mxu1 %v449_v63 }
 0x114   :  { %1438 = vmatmul.mubr.bf16.gmra.mxu1 %v450_v11 }
 0x115   :  { %1441 = vmatprep.mubr.bf16.mxu1 %v451_v8 }
 0x11c   :  { %1442 = vmatmul.mubr.bf16.gmra.mxu1 %v452_v18 }
 0x11d   :  { %1445 = vmatprep.mubr.bf16.mxu1 %v453_v17 }
 0x124   :  { %1446 = vmatmul.mubr.bf16.gmra.mxu1 %v454_v23 }
 0x1ac   :  { %v1419_v25 = vpop.f32.mrf.mxu1 }
 0x1ad   :  { %v567_v31 = vadd.f32 %v1419_v25, %v1903_v27 }
 0x1ae   :  { %v558_v26 = vpop.f32.mrf.mxu1 }
 0x1af   :  { %v559_v29 = vadd.f32 %v1903_v27, %v558_v26  ;;  %v687_v39 = vmax.f32 %v567_v31, 0.0 }
 0x1b0   :  { %v1420_v28 = vpop.f32.mrf.mxu1 }
 0x1b1   :  { %v570_v30 = vadd.f32 %v1420_v28, %v1903_v27  ;;  %v685_v36 = vmax.f32 %v559_v29, 0.0 }
 0x1b2   :  { %v561_v32 = vpop.f32.mrf.mxu1 }
 0x1b3   :  { %v562_v33 = vadd.f32 %v1903_v27, %v561_v32  ;;  %v688_v34 = vmax.f32 %v570_v30, 0.0 }
 0x1b4   :  { %v1423_v35 = vpop.f32.mrf.mxu1 }
 0x1b5   :  { %v686_v37 = vmax.f32 %v562_v33, 0.0  ;;  %v718_v44 = vpack.c.bf16 %v688_v34, %v687_v39  ;;  %v583_v48 = vadd.f32 %v1423_v35, %v1903_v27 }
 0x1b6   :  { %v574_v42 = vpop.f32.mrf.mxu1 }
 0x1b7   :  { %v717_v40 = vpack.c.bf16 %v686_v37, %v685_v36  ;;  %v575_v46 = vadd.f32 %v1903_v27, %v574_v42  ;;  %v691_v56 = vmax.f32 %v583_v48, 0.0 }
 0x1b8   :  { %v1424_v45 = vpop.f32.mrf.mxu1 }
 0x1b9   :  { %v586_v47 = vadd.f32 %v1424_v45, %v1903_v27  ;;  %1465 = vmatprep.mubr.bf16.mxu0 %v717_v40  ;;  %v689_v54 = vmax.f32 %v575_v46, 0.0 }
 0x1ba   :  { %v577_v49 = vpop.f32.mrf.mxu1  ;;  %1466 = vmatmul.mubr.bf16.vlgmr.msra.gmra.mxu0 %v718_v44 }
 0x1bb   :  { %v578_v50 = vadd.f32 %v1903_v27, %v577_v49  ;;  %v692_v51 = vmax.f32 %v586_v47, 0.0 }
 0x1bc   :  { %v1427_v53 = vpop.f32.mrf.mxu1 }
 0x1bd   :  { %v690_v55 = vmax.f32 %v578_v50, 0.0  ;;  %v720_v60 = vpack.c.bf16 %v692_v51, %v691_v56  ;;  %v599_v0 = vadd.f32 %v1427_v53, %v1903_v27 }
 0x1be   :  { %v590_v58 = vpop.f32.mrf.mxu1 }
 0x1bf   :  { %v719_v59 = vpack.c.bf16 %v690_v55, %v689_v54  ;;  %v591_v63 = vadd.f32 %v1903_v27, %v590_v58  ;;  %v695_v5 = vmax.f32 %v599_v0, 0.0 }
 0x1c0   :  { %v1428_v62 = vpop.f32.mrf.mxu1 }
 0x1c1   :  { %v602_v57 = vadd.f32 %v1428_v62, %v1903_v27  ;;  %1469 = vmatprep.mubr.bf16.mxu0 %v719_v59  ;;  %v693_v3 = vmax.f32 %v591_v63, 0.0 }
 0x1c2   :  { %v593_v1 = vpop.f32.mrf.mxu1  ;;  %1470 = vmatmul.mubr.bf16.gmra.mxu0 %v720_v60 }
 0x1c3   :  { %v594_v38 = vadd.f32 %v1903_v27, %v593_v1  ;;  %v696_v43 = vmax.f32 %v602_v57, 0.0 }
 0x1c4   :  { %v1431_v2 = vpop.f32.mrf.mxu1 }
 0x1c5   :  { %v694_v4 = vmax.f32 %v594_v38, 0.0  ;;  %v722_v8 = vpack.c.bf16 %v696_v43, %v695_v5  ;;  %v615_v52 = vadd.f32 %v1431_v2, %v1903_v27 }
 0x1c6   :  { %v606_v6 = vpop.f32.mrf.mxu1 }
 0x1c7   :  { %v721_v7 = vpack.c.bf16 %v694_v4, %v693_v3  ;;  %v607_v10 = vadd.f32 %v1903_v27, %v606_v6  ;;  %v699_v18 = vmax.f32 %v615_v52, 0.0 }
 0x1c8   :  { %v1432_v9 = vpop.f32.mrf.mxu1 }
 0x1c9   :  { %v618_v11 = vadd.f32 %v1432_v9, %v1903_v27  ;;  %1473 = vmatprep.mubr.bf16.mxu0 %v721_v7  ;;  %v697_v16 = vmax.f32 %v607_v10, 0.0 }
 0x1ca   :  { %v609_v12 = vpop.f32.mrf.mxu1  ;;  %1474 = vmatmul.mubr.bf16.gmra.mxu0 %v722_v8 }
 0x1cb   :  { %v610_v61 = vadd.f32 %v1903_v27, %v609_v12  ;;  %v700_v14 = vmax.f32 %v618_v11, 0.0 }
 0x1cc   :  { %v1435_v15 = vpop.f32.mrf.mxu1 }
 0x1cd   :  { %v698_v17 = vmax.f32 %v610_v61, 0.0  ;;  %v724_v21 = vpack.c.bf16 %v700_v14, %v699_v18  ;;  %v631_v24 = vadd.f32 %v1435_v15, %v1903_v27  ;;  %v1940_v61 = vld [vmem:[%s2107_s5] ss:$0 sm:$0xff] }
 0x1ce   :  { %v622_v19 = vpop.f32.mrf.mxu1 }
 0x1cf   :  { %v723_v20 = vpack.c.bf16 %v698_v17, %v697_v16  ;;  %v623_v23 = vadd.f32 %v1903_v27, %v622_v19  ;;  %v703_v31 = vmax.f32 %v631_v24, 0.0 }
 0x1d0   :  { %v1436_v22 = vpop.f32.mrf.mxu1 }
 0x1d1   :  { %v634_v13 = vadd.f32 %v1436_v22, %v1903_v27  ;;  %1477 = vmatprep.mubr.bf16.mxu0 %v723_v20  ;;  %v701_v29 = vmax.f32 %v623_v23, 0.0 }
 0x1d2   :  { %v625_v41 = vpop.f32.mrf.mxu1  ;;  %1478 = vmatmul.mubr.bf16.gmra.mxu0 %v724_v21 }
 0x1d3   :  { %v626_v25 = vadd.f32 %v1903_v27, %v625_v41  ;;  %v704_v26 = vmax.f32 %v634_v13, 0.0 }
 0x1d4   :  { %v1439_v28 = vpop.f32.mrf.mxu1 }
 0x1d5   :  { %v702_v30 = vmax.f32 %v626_v25, 0.0  ;;  %v726_v34 = vpack.c.bf16 %v704_v26, %v703_v31  ;;  %v647_v39 = vadd.f32 %v1439_v28, %v1903_v27 }
 0x1d6   :  { %v638_v32 = vpop.f32.mrf.mxu1 }
 0x1d7   :  { %v725_v33 = vpack.c.bf16 %v702_v30, %v701_v29  ;;  %v639_v36 = vadd.f32 %v1903_v27, %v638_v32  ;;  %v707_v48 = vmax.f32 %v647_v39, 0.0 }
 0x1d8   :  { %v1440_v35 = vpop.f32.mrf.mxu1 }
 0x1d9   :  { %v650_v37 = vadd.f32 %v1440_v35, %v1903_v27  ;;  %1481 = vmatprep.mubr.bf16.mxu0 %v725_v33  ;;  %v705_v46 = vmax.f32 %v639_v36, 0.0 }
 0x1da   :  { %v641_v42 = vpop.f32.mrf.mxu1  ;;  %1482 = vmatmul.mubr.bf16.gmra.mxu0 %v726_v34 }
 0x1db   :  { %v642_v40 = vadd.f32 %v1903_v27, %v641_v42  ;;  %v708_v44 = vmax.f32 %v650_v37, 0.0 }
 0x1dc   :  { %v1443_v45 = vpop.f32.mrf.mxu1 }
 0x1dd   :  { %v706_v47 = vmax.f32 %v642_v40, 0.0  ;;  %v728_v51 = vpack.c.bf16 %v708_v44, %v707_v48  ;;  %v663_v56 = vadd.f32 %v1443_v45, %v1903_v27 }
 0x1de   :  { %v654_v49 = vpop.f32.mrf.mxu1 }
 0x1df   :  { %v727_v50 = vpack.c.bf16 %v706_v47, %v705_v46  ;;  %v655_v54 = vadd.f32 %v1903_v27, %v654_v49  ;;  %v711_v0 = vmax.f32 %v663_v56, 0.0 }
 0x1e0   :  { %v1444_v53 = vpop.f32.mrf.mxu1 }
 0x1e1   :  { %v666_v55 = vadd.f32 %v1444_v53, %v1903_v27  ;;  %1485 = vmatprep.mubr.bf16.mxu0 %v727_v50  ;;  %v709_v63 = vmax.f32 %v655_v54, 0.0 }
 0x1e2   :  { %v657_v58 = vpop.f32.mrf.mxu1  ;;  %1486 = vmatmul.mubr.bf16.gmra.mxu0 %v728_v51 }
 0x1e3   :  { %v658_v59 = vadd.f32 %v1903_v27, %v657_v58  ;;  %v712_v60 = vmax.f32 %v666_v55, 0.0 }
 0x1e4   :  { %v1447_v62 = vpop.f32.mrf.mxu1 }
 0x1e5   :  { %v710_v57 = vmax.f32 %v658_v59, 0.0  ;;  %v730_v43 = vpack.c.bf16 %v712_v60, %v711_v0  ;;  %v679_v5 = vadd.f32 %v1447_v62, %v1903_v27 }
 0x1e6   :  { %v670_v1 = vpop.f32.mrf.mxu1 }
 0x1e7   :  { %v729_v38 = vpack.c.bf16 %v710_v57, %v709_v63  ;;  %v671_v3 = vadd.f32 %v1903_v27, %v670_v1  ;;  %v715_v11 = vmax.f32 %v679_v5, 0.0 }
 0x1e8   :  { %v1448_v2 = vpop.f32.mrf.mxu1 }
 0x1e9   :  { %v682_v4 = vadd.f32 %v1448_v2, %v1903_v27  ;;  %1489 = vmatprep.mubr.bf16.mxu0 %v729_v38  ;;  %v713_v9 = vmax.f32 %v671_v3, 0.0 }
 0x1ea   :  { %v673_v6 = vpop.f32.mrf.mxu1  ;;  %1490 = vmatmul.mubr.bf16.gmra.mxu0 %v730_v43 }
 0x1eb   :  { %v674_v7 = vadd.f32 %v1903_v27, %v673_v6  ;;  %v716_v8 = vmax.f32 %v682_v4, 0.0 }
 0x1ed   :  { %v714_v10 = vmax.f32 %v674_v7, 0.0  ;;  %v732_v12 = vpack.c.bf16 %v716_v8, %v715_v11 }
 0x1ef   :  { %v731_v52 = vpack.c.bf16 %v714_v10, %v713_v9 }
 0x1f1   :  { %1493 = vmatprep.mubr.bf16.mxu0 %v731_v52 }
 0x1f2   :  { %1494 = vmatmul.mubr.bf16.gmra.mxu0 %v732_v12 }
 0x27a   :  { %v1467_v14 = vpop.f32.mrf.mxu0 }
 0x27b   :  { %v847_v15 = vadd.f32 %v1467_v14, %v1940_v61 }
 0x27c   :  { %v838_v16 = vpop.f32.mrf.mxu0 }
 0x27d   :  { %v1254_v17 = vmul.f32 -1.442695, %v847_v15  ;;  %v839_v27 = vadd.f32 %v1940_v61, %v838_v16 }
 0x27e   :  { %v1468_v18 = vpop.f32.mrf.mxu0 }
 0x27f   :  { %1552 = vpow2.f32 %v1254_v17  ;;  %v1252_v19 = vmul.f32 -1.442695, %v839_v27  ;;  %v850_v20 = vadd.f32 %v1468_v18, %v1940_v61 }
 0x280   :  { %v841_v21 = vpop.f32.mrf.mxu0 }
 0x281   :  { %1554 = vpow2.f32 %v1252_v19  ;;  %v1255_v22 = vmul.f32 -1.442695, %v850_v20  ;;  %v842_v23 = vadd.f32 %v1940_v61, %v841_v21 }
 0x282   :  { %v1471_v13 = vpop.f32.mrf.mxu0 }
 0x283   :  { %1556 = vpow2.f32 %v1255_v22  ;;  %v1253_v24 = vmul.f32 -1.442695, %v842_v23  ;;  %v863_v41 = vadd.f32 %v1471_v13, %v1940_v61 }
 0x284   :  { %v854_v25 = vpop.f32.mrf.mxu0 }
 0x285   :  { %1558 = vpow2.f32 %v1253_v24  ;;  %v1258_v26 = vmul.f32 -1.442695, %v863_v41  ;;  %v855_v28 = vadd.f32 %v1940_v61, %v854_v25 }
 0x286   :  { %v1472_v29 = vpop.f32.mrf.mxu0 }
 0x287   :  { %1560 = vpow2.f32 %v1258_v26  ;;  %v1256_v30 = vmul.f32 -1.442695, %v855_v28  ;;  %v866_v31 = vadd.f32 %v1472_v29, %v1940_v61 }
 0x288   :  { %v857_v32 = vpop.f32.mrf.mxu0 }
 0x289   :  { %1562 = vpow2.f32 %v1256_v30  ;;  %v1259_v33 = vmul.f32 -1.442695, %v866_v31  ;;  %v858_v34 = vadd.f32 %v1940_v61, %v857_v32 }
 0x28a   :  { %v1475_v35 = vpop.f32.mrf.mxu0 }
 0x28b   :  { %1564 = vpow2.f32 %v1259_v33  ;;  %v1257_v36 = vmul.f32 -1.442695, %v858_v34  ;;  %v879_v37 = vadd.f32 %v1475_v35, %v1940_v61 }
 0x28c   :  { %v1553_v39 = vpop.eup %1552  ;;  %v870_v42 = vpop.f32.mrf.mxu0 }
 0x28d   :  { %v1063_v40 = vadd.f32 1.0, %v1553_v39  ;;  %1566 = vpow2.f32 %v1257_v36  ;;  %v1262_v44 = vmul.f32 -1.442695, %v879_v37  ;;  %v871_v45 = vadd.f32 %v1940_v61, %v870_v42 }
 0x28e   :  { %v1555_v46 = vpop.eup %1554  ;;  %v1476_v47 = vpop.f32.mrf.mxu0 }
 0x28f   :  { %1568 = vrcp.f32 %v1063_v40  ;;  %v1061_v48 = vadd.f32 1.0, %v1555_v46  ;;  %v1260_v49 = vmul.f32 -1.442695, %v871_v45  ;;  %v882_v50 = vadd.f32 %v1476_v47, %v1940_v61 }
 0x290   :  { %v1557_v51 = vpop.eup %1556  ;;  %1570 = vpow2.f32 %v1262_v44  ;;  %v873_v53 = vpop.f32.mrf.mxu0 }
 0x291   :  { %1572 = vrcp.f32 %v1061_v48  ;;  %v1064_v54 = vadd.f32 1.0, %v1557_v51  ;;  %v1263_v55 = vmul.f32 -1.442695, %v882_v50  ;;  %v874_v56 = vadd.f32 %v1940_v61, %v873_v53 }
 0x292   :  { %v1559_v58 = vpop.eup %1558  ;;  %1574 = vpow2.f32 %v1260_v49  ;;  %v1479_v59 = vpop.f32.mrf.mxu0 }
 0x293   :  { %1576 = vrcp.f32 %v1064_v54  ;;  %v1062_v60 = vadd.f32 1.0, %v1559_v58  ;;  %v1261_v62 = vmul.f32 -1.442695, %v874_v56  ;;  %v895_v63 = vadd.f32 %v1479_v59, %v1940_v61 }
 0x294   :  { %v1561_v57 = vpop.eup %1560  ;;  %1578 = vpow2.f32 %v1263_v55  ;;  %v886_v0 = vpop.f32.mrf.mxu0 }
 0x295   :  { %1580 = vrcp.f32 %v1062_v60  ;;  %v1067_v1 = vadd.f32 1.0, %v1561_v57  ;;  %v1266_v38 = vmul.f32 -1.442695, %v895_v63  ;;  %v887_v43 = vadd.f32 %v1940_v61, %v886_v0 }
 0x296   :  { %v1563_v2 = vpop.eup %1562  ;;  %1582 = vpow2.f32 %v1261_v62  ;;  %v1480_v3 = vpop.f32.mrf.mxu0 }
 0x297   :  { %1584 = vrcp.f32 %v1067_v1  ;;  %v1065_v4 = vadd.f32 1.0, %v1563_v2  ;;  %v1264_v5 = vmul.f32 -1.442695, %v887_v43  ;;  %v898_v6 = vadd.f32 %v1480_v3, %v1940_v61 }
 0x298   :  { %v1565_v7 = vpop.eup %1564  ;;  %1586 = vpow2.f32 %v1266_v38  ;;  %v889_v8 = vpop.f32.mrf.mxu0 }
 0x299   :  { %1588 = vrcp.f32 %v1065_v4  ;;  %v1068_v9 = vadd.f32 1.0, %v1565_v7  ;;  %v1267_v10 = vmul.f32 -1.442695, %v898_v6  ;;  %v890_v11 = vadd.f32 %v1940_v61, %v889_v8 }
 0x29a   :  { %v1567_v52 = vpop.eup %1566  ;;  %1590 = vpow2.f32 %v1264_v5  ;;  %v1483_v12 = vpop.f32.mrf.mxu0 }
 0x29b   :  { %1592 = vrcp.f32 %v1068_v9  ;;  %v1066_v14 = vadd.f32 1.0, %v1567_v52  ;;  %v1265_v15 = vmul.f32 -1.442695, %v890_v11  ;;  %v911_v16 = vadd.f32 %v1483_v12, %v1940_v61 }
 0x29c   :  { %v1569_v17 = vpop.eup %1568  ;;  %1594 = vpow2.f32 %v1267_v10  ;;  %v902_v27 = vpop.f32.mrf.mxu0 }
 0x29d   :  { %v1571_v18 = vpop.eup %1570  ;;  %1160 = vst.msk [vmem:[%s2108_s6 + $0x10] sm:$0xff] %vm1157_vm2, %v1569_v17  ;;  %1596 = vrcp.f32 %v1066_v14  ;;  %v1270_v19 = vmul.f32 -1.442695, %v911_v16  ;;  %v903_v20 = vadd.f32 %v1940_v61, %v902_v27 }
 0x29e   :  { %v1573_v21 = vpop.eup %1572  ;;  %v1071_v22 = vadd.f32 1.0, %v1571_v18  ;;  %1598 = vpow2.f32 %v1265_v15  ;;  %v1484_v23 = vpop.f32.mrf.mxu0 }
 0x29f   :  { %v1575_v13 = vpop.eup %1574  ;;  %1158 = vst.msk [vmem:[%s2108_s6] sm:$0xff] %vm1157_vm2, %v1573_v21  ;;  %1600 = vpow2.f32 %v1270_v19  ;;  %v1268_v24 = vmul.f32 -1.442695, %v903_v20  ;;  %v914_v41 = vadd.f32 %v1484_v23, %v1940_v61 }
 0x2a0   :  { %v1577_v25 = vpop.eup %1576  ;;  %1602 = vrcp.f32 %v1071_v22  ;;  %v1069_v26 = vadd.f32 1.0, %v1575_v13  ;;  %v905_v28 = vpop.f32.mrf.mxu0 }
 0x2a1   :  { %v1579_v29 = vpop.eup %1578  ;;  %1161 = vst.msk [vmem:[%s2108_s6 + $0x18] sm:$0xff] %vm1157_vm2, %v1577_v25  ;;  %1604 = vpow2.f32 %v1268_v24  ;;  %v1271_v30 = vmul.f32 -1.442695, %v914_v41  ;;  %v906_v31 = vadd.f32 %v1940_v61, %v905_v28 }
 0x2a2   :  { %v1581_v32 = vpop.eup %1580  ;;  %1606 = vrcp.f32 %v1069_v26  ;;  %v1072_v33 = vadd.f32 1.0, %v1579_v29  ;;  %v1487_v34 = vpop.f32.mrf.mxu0 }
 0x2a3   :  { %v1583_v35 = vpop.eup %1582  ;;  %1159 = vst.msk [vmem:[%s2108_s6 + $0x8] sm:$0xff] %vm1157_vm2, %v1581_v32  ;;  %1608 = vpow2.f32 %v1271_v30  ;;  %v1269_v36 = vmul.f32 -1.442695, %v906_v31  ;;  %v927_v37 = vadd.f32 %v1487_v34, %v1940_v61 }
 0x2a4   :  { %v1585_v39 = vpop.eup %1584  ;;  %1610 = vrcp.f32 %v1072_v33  ;;  %v1070_v42 = vadd.f32 1.0, %v1583_v35  ;;  %v918_v40 = vpop.f32.mrf.mxu0 }
 0x2a5   :  { %v1587_v44 = vpop.eup %1586  ;;  %1164 = vst.msk [vmem:[%s2108_s6 + $0x30] sm:$0xff] %vm1157_vm2, %v1585_v39  ;;  %1612 = vpow2.f32 %v1269_v36  ;;  %v1274_v45 = vmul.f32 -1.442695, %v927_v37  ;;  %v919_v46 = vadd.f32 %v1940_v61, %v918_v40 }
 0x2a6   :  { %v1589_v47 = vpop.eup %1588  ;;  %1614 = vrcp.f32 %v1070_v42  ;;  %v1075_v48 = vadd.f32 1.0, %v1587_v44  ;;  %v1488_v49 = vpop.f32.mrf.mxu0 }
 0x2a7   :  { %v1591_v50 = vpop.eup %1590  ;;  %1162 = vst.msk [vmem:[%s2108_s6 + $0x20] sm:$0xff] %vm1157_vm2, %v1589_v47  ;;  %1616 = vpow2.f32 %v1274_v45  ;;  %v1272_v51 = vmul.f32 -1.442695, %v919_v46  ;;  %v930_v53 = vadd.f32 %v1488_v49, %v1940_v61 }
 0x2a8   :  { %v1593_v54 = vpop.eup %1592  ;;  %1618 = vrcp.f32 %v1075_v48  ;;  %v1073_v55 = vadd.f32 1.0, %v1591_v50  ;;  %v921_v56 = vpop.f32.mrf.mxu0 }
 0x2a9   :  { %v1595_v58 = vpop.eup %1594  ;;  %1165 = vst.msk [vmem:[%s2108_s6 + $0x38] sm:$0xff] %vm1157_vm2, %v1593_v54  ;;  %1620 = vpow2.f32 %v1272_v51  ;;  %v1275_v59 = vmul.f32 -1.442695, %v930_v53  ;;  %v922_v60 = vadd.f32 %v1940_v61, %v921_v56 }
 0x2aa   :  { %v1597_v62 = vpop.eup %1596  ;;  %1622 = vrcp.f32 %v1073_v55  ;;  %v1076_v63 = vadd.f32 1.0, %v1595_v58  ;;  %v1491_v57 = vpop.f32.mrf.mxu0 }
 0x2ab   :  { %v1599_v0 = vpop.eup %1598  ;;  %1163 = vst.msk [vmem:[%s2108_s6 + $0x28] sm:$0xff] %vm1157_vm2, %v1597_v62  ;;  %1624 = vpow2.f32 %v1275_v59  ;;  %v1273_v1 = vmul.f32 -1.442695, %v922_v60  ;;  %v943_v38 = vadd.f32 %v1491_v57, %v1940_v61 }
 0x2ac   :  { %v1601_v43 = vpop.eup %1600  ;;  %1626 = vrcp.f32 %v1076_v63  ;;  %v1074_v2 = vadd.f32 1.0, %v1599_v0  ;;  %v934_v3 = vpop.f32.mrf.mxu0 }
 0x2ad   :  { %v1603_v4 = vpop.eup %1602  ;;  %v1079_v5 = vadd.f32 1.0, %v1601_v43  ;;  %1628 = vpow2.f32 %v1273_v1  ;;  %v1278_v6 = vmul.f32 -1.442695, %v943_v38  ;;  %v935_v7 = vadd.f32 %v1940_v61, %v934_v3 }
 0x2ae   :  { %v1605_v8 = vpop.eup %1604  ;;  %1168 = vst.msk [vmem:[%s2108_s6 + $0x50] sm:$0xff] %vm1157_vm2, %v1603_v4  ;;  %1630 = vrcp.f32 %v1074_v2  ;;  %v1492_v9 = vpop.f32.mrf.mxu0 }
 0x2af   :  { %v1607_v10 = vpop.eup %1606  ;;  %1632 = vrcp.f32 %v1079_v5  ;;  %v1077_v11 = vadd.f32 1.0, %v1605_v8  ;;  %v1276_v52 = vmul.f32 -1.442695, %v935_v7  ;;  %v946_v12 = vadd.f32 %v1492_v9, %v1940_v61 }
 0x2b0   :  { %v1609_v14 = vpop.eup %1608  ;;  %1166 = vst.msk [vmem:[%s2108_s6 + $0x40] sm:$0xff] %vm1157_vm2, %v1607_v10  ;;  %1634 = vpow2.f32 %v1278_v6  ;;  %v937_v15 = vpop.f32.mrf.mxu0 }
 0x2b1   :  { %v1611_v16 = vpop.eup %1610  ;;  %1636 = vrcp.f32 %v1077_v11  ;;  %v1080_v17 = vadd.f32 1.0, %v1609_v14  ;;  %v1279_v27 = vmul.f32 -1.442695, %v946_v12  ;;  %v938_v18 = vadd.f32 %v1940_v61, %v937_v15 }
 0x2b2   :  { %v1613_v19 = vpop.eup %1612  ;;  %1169 = vst.msk [vmem:[%s2108_s6 + $0x58] sm:$0xff] %vm1157_vm2, %v1611_v16  ;;  %1638 = vpow2.f32 %v1276_v52  ;;  %v1495_v20 = vpop.f32.mrf.mxu0 }
 0x2b3   :  { %v1615_v21 = vpop.eup %1614  ;;  %1640 = vrcp.f32 %v1080_v17  ;;  %v1078_v22 = vadd.f32 1.0, %v1613_v19  ;;  %v1277_v23 = vmul.f32 -1.442695, %v938_v18  ;;  %v959_v13 = vadd.f32 %v1495_v20, %v1940_v61 }
 0x2b4   :  { %v1617_v24 = vpop.eup %1616  ;;  %1167 = vst.msk [vmem:[%s2108_s6 + $0x48] sm:$0xff] %vm1157_vm2, %v1615_v21  ;;  %1642 = vpow2.f32 %v1279_v27  ;;  %v950_v41 = vpop.f32.mrf.mxu0 }
 0x2b5   :  { %v1619_v25 = vpop.eup %1618  ;;  %1644 = vrcp.f32 %v1078_v22  ;;  %v1083_v26 = vadd.f32 1.0, %v1617_v24  ;;  %v1282_v28 = vmul.f32 -1.442695, %v959_v13  ;;  %v951_v29 = vadd.f32 %v1940_v61, %v950_v41 }
 0x2b6   :  { %v1621_v30 = vpop.eup %1620  ;;  %1172 = vst.msk [vmem:[%s2108_s6 + $0x70] sm:$0xff] %vm1157_vm2, %v1619_v25  ;;  %1646 = vpow2.f32 %v1277_v23  ;;  %v1496_v31 = vpop.f32.mrf.mxu0 }
 0x2b7   :  { %v1623_v32 = vpop.eup %1622  ;;  %1648 = vrcp.f32 %v1083_v26  ;;  %v1081_v33 = vadd.f32 1.0, %v1621_v30  ;;  %v1280_v34 = vmul.f32 -1.442695, %v951_v29  ;;  %v962_v35 = vadd.f32 %v1496_v31, %v1940_v61 }
 0x2b8   :  { %v1625_v36 = vpop.eup %1624  ;;  %1170 = vst.msk [vmem:[%s2108_s6 + $0x60] sm:$0xff] %vm1157_vm2, %v1623_v32  ;;  %1650 = vpow2.f32 %v1282_v28  ;;  %v953_v37 = vpop.f32.mrf.mxu0 }
 0x2b9   :  { %v1627_v39 = vpop.eup %1626  ;;  %1652 = vrcp.f32 %v1081_v33  ;;  %v1084_v42 = vadd.f32 1.0, %v1625_v36  ;;  %v1283_v40 = vmul.f32 -1.442695, %v962_v35  ;;  %v954_v44 = vadd.f32 %v1940_v61, %v953_v37 }
 0x2ba   :  { %v1629_v45 = vpop.eup %1628  ;;  %1173 = vst.msk [vmem:[%s2108_s6 + $0x78] sm:$0xff] %vm1157_vm2, %v1627_v39  ;;  %1654 = vpow2.f32 %v1280_v34 }
 0x2bb   :  { %v1631_v46 = vpop.eup %1630  ;;  %1656 = vrcp.f32 %v1084_v42  ;;  %v1082_v47 = vadd.f32 1.0, %v1629_v45  ;;  %v1281_v48 = vmul.f32 -1.442695, %v954_v44 }
 0x2bc   :  { %v1633_v49 = vpop.eup %1632  ;;  %1171 = vst.msk [vmem:[%s2108_s6 + $0x68] sm:$0xff] %vm1157_vm2, %v1631_v46  ;;  %1658 = vpow2.f32 %v1283_v40 }
 0x2bd   :  { %v1635_v50 = vpop.eup %1634  ;;  %1176 = vst.msk [vmem:[%s2108_s6 + $0x90] sm:$0xff] %vm1157_vm2, %v1633_v49  ;;  %1660 = vrcp.f32 %v1082_v47 }
 0x2be   :  { %v1637_v61 = vpop.eup %1636  ;;  %v1087_v51 = vadd.f32 1.0, %v1635_v50  ;;  %1662 = vpow2.f32 %v1281_v48 }
 0x2bf   :  { %v1639_v53 = vpop.eup %1638  ;;  %1174 = vst.msk [vmem:[%s2108_s6 + $0x80] sm:$0xff] %vm1157_vm2, %v1637_v61 }
 0x2c0   :  { %v1641_v54 = vpop.eup %1640  ;;  %1664 = vrcp.f32 %v1087_v51  ;;  %v1085_v55 = vadd.f32 1.0, %v1639_v53 }
 0x2c1   :  { %v1643_v56 = vpop.eup %1642  ;;  %1177 = vst.msk [vmem:[%s2108_s6 + $0x98] sm:$0xff] %vm1157_vm2, %v1641_v54 }
 0x2c2   :  { %v1645_v58 = vpop.eup %1644  ;;  %1666 = vrcp.f32 %v1085_v55  ;;  %v1088_v59 = vadd.f32 1.0, %v1643_v56 }
 0x2c3   :  { %v1647_v60 = vpop.eup %1646  ;;  %1175 = vst.msk [vmem:[%s2108_s6 + $0x88] sm:$0xff] %vm1157_vm2, %v1645_v58 }
 0x2c4   :  { %v1649_v62 = vpop.eup %1648  ;;  %1668 = vrcp.f32 %v1088_v59  ;;  %v1086_v63 = vadd.f32 1.0, %v1647_v60 }
 0x2c5   :  { %v1651_v57 = vpop.eup %1650  ;;  %1180 = vst.msk [vmem:[%s2108_s6 + $0xb0] sm:$0xff] %vm1157_vm2, %v1649_v62 }
 0x2c6   :  { %v1653_v0 = vpop.eup %1652  ;;  %1670 = vrcp.f32 %v1086_v63  ;;  %v1091_v1 = vadd.f32 1.0, %v1651_v57 }
 0x2c7   :  { %v1655_v38 = vpop.eup %1654  ;;  %1178 = vst.msk [vmem:[%s2108_s6 + $0xa0] sm:$0xff] %vm1157_vm2, %v1653_v0 }
 0x2c8   :  { %v1657_v43 = vpop.eup %1656  ;;  %1672 = vrcp.f32 %v1091_v1  ;;  %v1089_v2 = vadd.f32 1.0, %v1655_v38 }
 0x2c9   :  { %v1659_v3 = vpop.eup %1658  ;;  %1181 = vst.msk [vmem:[%s2108_s6 + $0xb8] sm:$0xff] %vm1157_vm2, %v1657_v43 }
 0x2ca   :  { %v1661_v4 = vpop.eup %1660  ;;  %1674 = vrcp.f32 %v1089_v2  ;;  %v1092_v5 = vadd.f32 1.0, %v1659_v3 }
 0x2cb   :  { %v1663_v6 = vpop.eup %1662  ;;  %1179 = vst.msk [vmem:[%s2108_s6 + $0xa8] sm:$0xff] %vm1157_vm2, %v1661_v4 }
 0x2cc   :  { %1676 = vrcp.f32 %v1092_v5  ;;  %v1090_v7 = vadd.f32 1.0, %v1663_v6 }
 0x2cd   :  { %v1665_v8 = vpop.eup %1664 }
 0x2ce   :  { %1184 = vst.msk [vmem:[%s2108_s6 + $0xd0] sm:$0xff] %vm1157_vm2, %v1665_v8  ;;  %1678 = vrcp.f32 %v1090_v7 }
 0x2cf   :  { %v1667_v9 = vpop.eup %1666 }
 0x2d0   :  { %1182 = vst.msk [vmem:[%s2108_s6 + $0xc0] sm:$0xff] %vm1157_vm2, %v1667_v9 }
 0x2d1   :  { %v1669_v10 = vpop.eup %1668 }
 0x2d2   :  { %1185 = vst.msk [vmem:[%s2108_s6 + $0xd8] sm:$0xff] %vm1157_vm2, %v1669_v10 }
 0x2d3   :  { %v1671_v11 = vpop.eup %1670 }
 0x2d4   :  { %1183 = vst.msk [vmem:[%s2108_s6 + $0xc8] sm:$0xff] %vm1157_vm2, %v1671_v11 }
 0x2d5   :  { %v1673_v52 = vpop.eup %1672 }
 0x2d6   :  { %1188 = vst.msk [vmem:[%s2108_s6 + $0xf0] sm:$0xff] %vm1157_vm2, %v1673_v52 }
 0x2d7   :  { %v1675_v12 = vpop.eup %1674 }
 0x2d8   :  { %1186 = vst.msk [vmem:[%s2108_s6 + $0xe0] sm:$0xff] %vm1157_vm2, %v1675_v12 }
 0x2d9   :  { %v1677_v14 = vpop.eup %1676 }
 0x2da   :  { %1189 = vst.msk [vmem:[%s2108_s6 + $0xf8] sm:$0xff] %vm1157_vm2, %v1677_v14 }
 0x2db   :  { %v1679_v15 = vpop.eup %1678 }
 0x2dc   :  { %1187 = vst.msk [vmem:[%s2108_s6 + $0xe8] sm:$0xff] %vm1157_vm2, %v1679_v15 }

</bundles_post_ra>
